<compile_context>
chip_gen: v7x
topology: tpu7x:2x2x1
jax: 0.10.0
libtpu: 0.0.40
codegen_flags: <defaults>
</compile_context>

<pallas_src>
import jax
import jax.numpy as jnp
import numpy as np
from jax.experimental import pallas as pl
from jax.experimental.pallas import tpu as pltpu

_HIGHEST = jax.lax.Precision.HIGHEST  # used only in wrapper/reference XLA dots


# ----------------------------- Pallas kernel -------------------------------

def _layernorm(v, eps=1e-5):
    # Two-pass statistics (mean, then centered variance): no cancellation.
    mean = jnp.mean(v, axis=-1, keepdims=True)
    c = v - mean
    var = jnp.mean(c * c, axis=-1, keepdims=True)
    return c * jax.lax.rsqrt(var + eps)


def _silu(v):
    # x * sigmoid(x) == 0.5 * x * (1 + tanh(x/2)) -> a single EUP transcendental
    return 0.5 * v * (1.0 + jnp.tanh(0.5 * v))


def _lin(v, w_ref, b_ref):
    return jnp.dot(v, w_ref[...], preferred_element_type=jnp.float32) + b_ref[...]


def structffn_kernel(x_ref, t_ref, freq_ref, phase_ref, w_in_ref, b_in_ref,
                     w0_ref, b0_ref, w1_ref, b1_ref,
                     w2_ref, b2_ref, w3_ref, b3_ref, out_ref):
    # input Linear: (TM, D_in) @ (D_in, 2H) -> f32, + bias
    h = _lin(x_ref[...], w_in_ref, b_in_ref)

    # TimeEncoder: [sin(t*f), cos(t*f)] == sin(t*f_full + phase); no lane concat.
    h = h + jnp.sin(t_ref[...] * freq_ref[...] + phase_ref[...])

    # layers 0..3: LayerNorm (affine folded into the Linear) -> Linear -> SiLU
    # TODO(synk): nn.Dropout(0.1) is train-mode stochastic; eval-mode identity here.
    h = _silu(_lin(_layernorm(h), w0_ref, b0_ref))
    h = _silu(_lin(_layernorm(h), w1_ref, b1_ref))
    h = _silu(_lin(_layernorm(h), w2_ref, b2_ref))
    h = _lin(_layernorm(h), w3_ref, b3_ref)

    out_ref[...] = h.astype(out_ref.dtype)


# ------------------------------ Wrapper -------------------------------------

def _round_up(n, m):
    return ((n + m - 1) // m) * m


def struct_ffn_forward(x, time_step, batch, params, *, row_tile=256):
    """Pallas implementation of StructFFN.forward (eval mode).

    x:         (N, input_dim) float32
    time_step: (num_graphs,)  float32
    batch:     (N,)           int32   graph id per node
    """
    N, input_dim = x.shape
    x = x.astype(jnp.float32)

    # glue: index_select(time_step, 0, batch).unsqueeze(-1)
    t_node = time_step[batch][:, None].astype(jnp.float32)       # (N, 1)

    # --- row tiling: clamp to padded N (f32 sublane tile of 8); guarantee the
    # grid has >= 2 steps where possible so both v7x TensorCores get work.
    row_tile = _round_up(max(8, min(row_tile, _round_up(N, 8))), 8)
    n_pad = _round_up(N, row_tile)
    if n_pad // row_tile < 2 and row_tile > 8:
        row_tile = _round_up(max(8, row_tile // 2), 8)
        n_pad = _round_up(N, row_tile)
    if n_pad != N:
        x = jnp.pad(x, ((0, n_pad - N), (0, 0)))
        t_node = jnp.pad(t_node, ((0, n_pad - N), (0, 0)))

    # --- one-time parameter layout plumbing (outside the kernel) ---
    inv_freq = params["inv_freq"].astype(jnp.float32)             # (1, H)
    half = inv_freq.shape[1]
    freq = jnp.tile(inv_freq, (1, 2))                             # (1, 2H)
    phase = jnp.concatenate(
        [jnp.zeros((1, half), jnp.float32),
         jnp.full((1, half), np.pi / 2.0, jnp.float32)], axis=-1)  # (1, 2H)

    w_in = params["w_in"].astype(jnp.float32)
    b_in = params["b_in"].astype(jnp.float32)

    # Fold LayerNorm affine into the following Linear (exact reparameterization):
    #   (norm * g + be) @ w + b  ==  norm @ (g.T * w) + (be @ w + b)
    fused = []
    for (g, be, w, b) in params["layers"]:
        w_eff = (w * g.reshape(-1, 1)).astype(jnp.float32)
        b_eff = (jnp.dot(be, w, precision=_HIGHEST) + b).astype(jnp.float32)
        fused.append((w_eff, b_eff))
    out_dim = fused[-1][0].shape[1]
    hidden2 = w_in.shape[1]

    consts = [freq, phase, w_in, b_in]
    for (w, b) in fused:
        consts += [w, b]

    def row_spec(d):
        return pl.BlockSpec((row_tile, d), lambda i: (i, 0))

    def const_spec(a):
        return pl.BlockSpec(a.shape, lambda i: (0, 0))

    # VMEM budget from the actual buffers: streamed blocks (double-buffered),
    # constants, plus headroom for the live (row_tile, 2H) f32 activation chain.
    stream_bytes = 2 * row_tile * (input_dim + 1 + out_dim) * 4
    const_bytes = sum(int(np.prod(c.shape)) * 4 for c in consts)
    act_bytes = 8 * row_tile * hidden2 * 4
    vmem_limit = int(min(32 * 1024 * 1024,
                         max(16 * 1024 * 1024,
                             stream_bytes + 2 * const_bytes + act_bytes + (1 << 20))))

    out = pl.pallas_call(
        structffn_kernel,
        out_shape=jax.ShapeDtypeStruct((n_pad, out_dim), jnp.float32),
        grid=(n_pad // row_tile,),
        in_specs=[row_spec(input_dim), row_spec(1)] + [const_spec(c) for c in consts],
        out_specs=row_spec(out_dim),
        compiler_params=pltpu.CompilerParams(
            dimension_semantics=("parallel",),
            vmem_limit_bytes=vmem_limit),
    )(x, t_node, *consts)

    return out[:N] if n_pad != N else out


# --------------------------- Parameter setup --------------------------------

def make_params(key, input_dim, hidden_dim):
    dims = [hidden_dim * 2, hidden_dim, hidden_dim // 2, hidden_dim // 4, 4 * 3]
    embed_size = hidden_dim * 2
    inv_freq = (1.0 / 10000.0 ** (np.arange(0, embed_size, 2, dtype=np.float32)
                                  / embed_size))[None, :]        # (1, H)

    keys = jax.random.split(key, 2 + 4 * len(dims))
    ki = iter(range(len(keys)))

    def lin(kw, kb, d_in, d_out):
        w = jax.random.normal(keys[kw], (d_in, d_out), jnp.float32) / np.sqrt(d_in)
        b = 0.1 * jax.random.normal(keys[kb], (1, d_out), jnp.float32)
        return w, b

    w_in, b_in = lin(next(ki), next(ki), input_dim, dims[0])

    layers = []
    for i in range(len(dims) - 1):
        g = 1.0 + 0.1 * jax.random.normal(keys[next(ki)], (1, dims[i]), jnp.float32)
        be = 0.1 * jax.random.normal(keys[next(ki)], (1, dims[i]), jnp.float32)
        w, b = lin(next(ki), next(ki), dims[i], dims[i + 1])
        layers.append((g, be, w, b))

    return {"inv_freq": jnp.asarray(inv_freq), "w_in": w_in, "b_in": b_in,
            "layers": layers}


# ----------------------------- Pure-JAX ref ----------------------------------

def struct_ffn_ref(x, time_step, batch, params):
    t = time_step[batch][:, None]
    h = jnp.dot(x, params["w_in"], precision=_HIGHEST) + params["b_in"]
    ang = t * params["inv_freq"]
    h = h + jnp.concatenate([jnp.sin(ang), jnp.cos(ang)], axis=-1)
    layers = params["layers"]
    for i, (g, be, w, b) in enumerate(layers):
        m = jnp.mean(h, axis=-1, keepdims=True)
        c = h - m
        v = jnp.mean(c * c, axis=-1, keepdims=True)
        h = jnp.dot(c * jax.lax.rsqrt(v + 1e-5) * g + be, w, precision=_HIGHEST) + b
        if i < len(layers) - 1:
            h = h * jax.nn.sigmoid(h)
    return h


# --------------------------------- Main --------------------------------------

if __name__ == "__main__":
    N, input_dim, hidden_dim, num_graphs = 16, 16, 32, 4

    key = jax.random.PRNGKey(0)
    k_x, k_t, k_b, k_p = jax.random.split(key, 4)

    x = jax.random.normal(k_x, (N, input_dim), jnp.float32)
    time_step = jax.random.uniform(k_t, (num_graphs,), jnp.float32, 0.0, 10.0)
    batch = jax.random.randint(k_b, (N,), 0, num_graphs, jnp.int32)

    params = make_params(k_p, input_dim, hidden_dim)

    out = struct_ffn_forward(x, time_step, batch, params)
    out = jax.block_until_ready(out)

    ref = struct_ffn_ref(x, time_step, batch, params)
    # Tolerance covers the backend's default f32 matmul precision on the MXU;
    # all elementwise math is f32 and LayerNorm uses two-pass statistics.
    np.testing.assert_allclose(np.asarray(out), np.asarray(ref),
                               rtol=2e-2, atol=2e-2)
    print("KERNEL_OK")
</pallas_src>

<mosaic_0001>
module attributes {stable_mosaic.version = 11 : i64} {
  func.func @structffn_kernel(%arg0: i32, %arg1: memref<8x16xf32, #tpu.memory_space<vmem>>, %arg2: memref<8x1xf32, #tpu.memory_space<vmem>>, %arg3: memref<1x64xf32, #tpu.memory_space<vmem>>, %arg4: memref<1x64xf32, #tpu.memory_space<vmem>>, %arg5: memref<16x64xf32, #tpu.memory_space<vmem>>, %arg6: memref<1x64xf32, #tpu.memory_space<vmem>>, %arg7: memref<64x32xf32, #tpu.memory_space<vmem>>, %arg8: memref<1x32xf32, #tpu.memory_space<vmem>>, %arg9: memref<32x16xf32, #tpu.memory_space<vmem>>, %arg10: memref<1x16xf32, #tpu.memory_space<vmem>>, %arg11: memref<16x8xf32, #tpu.memory_space<vmem>>, %arg12: memref<1x8xf32, #tpu.memory_space<vmem>>, %arg13: memref<8x12xf32, #tpu.memory_space<vmem>>, %arg14: memref<1x12xf32, #tpu.memory_space<vmem>>, %arg15: memref<8x12xf32, #tpu.memory_space<vmem>>) attributes {dimension_semantics = [#tpu.dimension_semantics<parallel>], iteration_bounds = array<i64: 2>, scalar_prefetch = 0 : i64, scratch_operands = 0 : i64, tpu.core_type = #tpu.core_type<tc>, window_params = [{transform_indices = @transform_0, window_bounds = array<i64: 8, 16>}, {transform_indices = @transform_1, window_bounds = array<i64: 8, 1>}, {pipeline_mode = #tpu.pipeline_mode<synchronous>, transform_indices = @transform_2, window_bounds = array<i64: 1, 64>}, {pipeline_mode = #tpu.pipeline_mode<synchronous>, transform_indices = @transform_3, window_bounds = array<i64: 1, 64>}, {pipeline_mode = #tpu.pipeline_mode<synchronous>, transform_indices = @transform_4, window_bounds = array<i64: 16, 64>}, {pipeline_mode = #tpu.pipeline_mode<synchronous>, transform_indices = @transform_5, window_bounds = array<i64: 1, 64>}, {pipeline_mode = #tpu.pipeline_mode<synchronous>, transform_indices = @transform_6, window_bounds = array<i64: 64, 32>}, {pipeline_mode = #tpu.pipeline_mode<synchronous>, transform_indices = @transform_7, window_bounds = array<i64: 1, 32>}, {pipeline_mode = #tpu.pipeline_mode<synchronous>, transform_indices = @transform_8, window_bounds = array<i64: 32, 16>}, {pipeline_mode = #tpu.pipeline_mode<synchronous>, transform_indices = @transform_9, window_bounds = array<i64: 1, 16>}, {pipeline_mode = #tpu.pipeline_mode<synchronous>, transform_indices = @transform_10, window_bounds = array<i64: 16, 8>}, {pipeline_mode = #tpu.pipeline_mode<synchronous>, transform_indices = @transform_11, window_bounds = array<i64: 1, 8>}, {pipeline_mode = #tpu.pipeline_mode<synchronous>, transform_indices = @transform_12, window_bounds = array<i64: 8, 12>}, {pipeline_mode = #tpu.pipeline_mode<synchronous>, transform_indices = @transform_13, window_bounds = array<i64: 1, 12>}, {transform_indices = @transform_14, window_bounds = array<i64: 8, 12>}]} {
    %c0 = arith.constant 0 : index
    %c0_0 = arith.constant 0 : index
    %0 = vector.load %arg1[%c0, %c0_0] : memref<8x16xf32, #tpu.memory_space<vmem>>, vector<8x16xf32>
    %c0_1 = arith.constant 0 : index
    %c0_2 = arith.constant 0 : index
    %1 = vector.load %arg5[%c0_1, %c0_2] : memref<16x64xf32, #tpu.memory_space<vmem>>, vector<16x64xf32>
    %cst = arith.constant dense<0.000000e+00> : vector<8x64xf32>
    %2 = tpu.matmul %0, %1, %cst {dimension_numbers = #tpu.dot_dimension_numbers<[1], [0], [0], [1], [0, 0, 1, 1], [], []>} : vector<8x16xf32>, vector<16x64xf32>, vector<8x64xf32> -> vector<8x64xf32>
    %c0_3 = arith.constant 0 : index
    %c0_4 = arith.constant 0 : index
    %3 = vector.load %arg6[%c0_3, %c0_4] : memref<1x64xf32, #tpu.memory_space<vmem>>, vector<1x64xf32>
    %4 = vector.broadcast %3 : vector<1x64xf32> to vector<8x64xf32>
    %5 = arith.addf %2, %4 : vector<8x64xf32>
    %c0_5 = arith.constant 0 : index
    %c0_6 = arith.constant 0 : index
    %6 = vector.load %arg2[%c0_5, %c0_6] : memref<8x1xf32, #tpu.memory_space<vmem>>, vector<8x1xf32>
    %c0_7 = arith.constant 0 : index
    %c0_8 = arith.constant 0 : index
    %7 = vector.load %arg3[%c0_7, %c0_8] : memref<1x64xf32, #tpu.memory_space<vmem>>, vector<1x64xf32>
    %8 = vector.broadcast %6 : vector<8x1xf32> to vector<8x64xf32>
    %9 = vector.broadcast %7 : vector<1x64xf32> to vector<8x64xf32>
    %10 = arith.mulf %8, %9 : vector<8x64xf32>
    %c0_9 = arith.constant 0 : index
    %c0_10 = arith.constant 0 : index
    %11 = vector.load %arg4[%c0_9, %c0_10] : memref<1x64xf32, #tpu.memory_space<vmem>>, vector<1x64xf32>
    %12 = vector.broadcast %11 : vector<1x64xf32> to vector<8x64xf32>
    %13 = arith.addf %10, %12 : vector<8x64xf32>
    %14 = math.sin %13 : vector<8x64xf32>
    %15 = arith.addf %5, %14 : vector<8x64xf32>
    %cst_11 = arith.constant dense<0.000000e+00> : vector<8xf32>
    %16 = vector.multi_reduction <add>, %15, %cst_11 [1] : vector<8x64xf32> to vector<8xf32>
    %17 = vector.shape_cast %16 : vector<8xf32> to vector<8x1xf32>
    %cst_12 = arith.constant 6.400000e+01 : f32
    %18 = vector.broadcast %cst_12 : f32 to vector<8x1xf32>
    %19 = arith.divf %17, %18 : vector<8x1xf32>
    %20 = vector.broadcast %19 : vector<8x1xf32> to vector<8x64xf32>
    %21 = arith.subf %15, %20 : vector<8x64xf32>
    %22 = arith.mulf %21, %21 : vector<8x64xf32>
    %cst_13 = arith.constant dense<0.000000e+00> : vector<8xf32>
    %23 = vector.multi_reduction <add>, %22, %cst_13 [1] : vector<8x64xf32> to vector<8xf32>
    %24 = vector.shape_cast %23 : vector<8xf32> to vector<8x1xf32>
    %cst_14 = arith.constant 6.400000e+01 : f32
    %25 = vector.broadcast %cst_14 : f32 to vector<8x1xf32>
    %26 = arith.divf %24, %25 : vector<8x1xf32>
    %cst_15 = arith.constant 9.99999974E-6 : f32
    %27 = vector.broadcast %cst_15 : f32 to vector<8x1xf32>
    %28 = arith.addf %26, %27 : vector<8x1xf32>
    %29 = math.rsqrt %28 : vector<8x1xf32>
    %30 = vector.broadcast %29 : vector<8x1xf32> to vector<8x64xf32>
    %31 = arith.mulf %21, %30 : vector<8x64xf32>
    %c0_16 = arith.constant 0 : index
    %c0_17 = arith.constant 0 : index
    %32 = vector.load %arg7[%c0_16, %c0_17] : memref<64x32xf32, #tpu.memory_space<vmem>>, vector<64x32xf32>
    %cst_18 = arith.constant dense<0.000000e+00> : vector<8x32xf32>
    %33 = tpu.matmul %31, %32, %cst_18 {dimension_numbers = #tpu.dot_dimension_numbers<[1], [0], [0], [1], [0, 0, 1, 1], [], []>} : vector<8x64xf32>, vector<64x32xf32>, vector<8x32xf32> -> vector<8x32xf32>
    %c0_19 = arith.constant 0 : index
    %c0_20 = arith.constant 0 : index
    %34 = vector.load %arg8[%c0_19, %c0_20] : memref<1x32xf32, #tpu.memory_space<vmem>>, vector<1x32xf32>
    %35 = vector.broadcast %34 : vector<1x32xf32> to vector<8x32xf32>
    %36 = arith.addf %33, %35 : vector<8x32xf32>
    %cst_21 = arith.constant 5.000000e-01 : f32
    %37 = vector.broadcast %cst_21 : f32 to vector<8x32xf32>
    %38 = arith.mulf %37, %36 : vector<8x32xf32>
    %cst_22 = arith.constant 5.000000e-01 : f32
    %39 = vector.broadcast %cst_22 : f32 to vector<8x32xf32>
    %40 = arith.mulf %39, %36 : vector<8x32xf32>
    %41 = math.tanh %40 : vector<8x32xf32>
    %cst_23 = arith.constant 1.000000e+00 : f32
    %42 = vector.broadcast %cst_23 : f32 to vector<8x32xf32>
    %43 = arith.addf %42, %41 : vector<8x32xf32>
    %44 = arith.mulf %38, %43 : vector<8x32xf32>
    %cst_24 = arith.constant dense<0.000000e+00> : vector<8xf32>
    %45 = vector.multi_reduction <add>, %44, %cst_24 [1] : vector<8x32xf32> to vector<8xf32>
    %46 = vector.shape_cast %45 : vector<8xf32> to vector<8x1xf32>
    %cst_25 = arith.constant 3.200000e+01 : f32
    %47 = vector.broadcast %cst_25 : f32 to vector<8x1xf32>
    %48 = arith.divf %46, %47 : vector<8x1xf32>
    %49 = vector.broadcast %48 : vector<8x1xf32> to vector<8x32xf32>
    %50 = arith.subf %44, %49 : vector<8x32xf32>
    %51 = arith.mulf %50, %50 : vector<8x32xf32>
    %cst_26 = arith.constant dense<0.000000e+00> : vector<8xf32>
    %52 = vector.multi_reduction <add>, %51, %cst_26 [1] : vector<8x32xf32> to vector<8xf32>
    %53 = vector.shape_cast %52 : vector<8xf32> to vector<8x1xf32>
    %cst_27 = arith.constant 3.200000e+01 : f32
    %54 = vector.broadcast %cst_27 : f32 to vector<8x1xf32>
    %55 = arith.divf %53, %54 : vector<8x1xf32>
    %cst_28 = arith.constant 9.99999974E-6 : f32
    %56 = vector.broadcast %cst_28 : f32 to vector<8x1xf32>
    %57 = arith.addf %55, %56 : vector<8x1xf32>
    %58 = math.rsqrt %57 : vector<8x1xf32>
    %59 = vector.broadcast %58 : vector<8x1xf32> to vector<8x32xf32>
    %60 = arith.mulf %50, %59 : vector<8x32xf32>
    %c0_29 = arith.constant 0 : index
    %c0_30 = arith.constant 0 : index
    %61 = vector.load %arg9[%c0_29, %c0_30] : memref<32x16xf32, #tpu.memory_space<vmem>>, vector<32x16xf32>
    %cst_31 = arith.constant dense<0.000000e+00> : vector<8x16xf32>
    %62 = tpu.matmul %60, %61, %cst_31 {dimension_numbers = #tpu.dot_dimension_numbers<[1], [0], [0], [1], [0, 0, 1, 1], [], []>} : vector<8x32xf32>, vector<32x16xf32>, vector<8x16xf32> -> vector<8x16xf32>
    %c0_32 = arith.constant 0 : index
    %c0_33 = arith.constant 0 : index
    %63 = vector.load %arg10[%c0_32, %c0_33] : memref<1x16xf32, #tpu.memory_space<vmem>>, vector<1x16xf32>
    %64 = vector.broadcast %63 : vector<1x16xf32> to vector<8x16xf32>
    %65 = arith.addf %62, %64 : vector<8x16xf32>
    %cst_34 = arith.constant 5.000000e-01 : f32
    %66 = vector.broadcast %cst_34 : f32 to vector<8x16xf32>
    %67 = arith.mulf %66, %65 : vector<8x16xf32>
    %cst_35 = arith.constant 5.000000e-01 : f32
    %68 = vector.broadcast %cst_35 : f32 to vector<8x16xf32>
    %69 = arith.mulf %68, %65 : vector<8x16xf32>
    %70 = math.tanh %69 : vector<8x16xf32>
    %cst_36 = arith.constant 1.000000e+00 : f32
    %71 = vector.broadcast %cst_36 : f32 to vector<8x16xf32>
    %72 = arith.addf %71, %70 : vector<8x16xf32>
    %73 = arith.mulf %67, %72 : vector<8x16xf32>
    %cst_37 = arith.constant dense<0.000000e+00> : vector<8xf32>
    %74 = vector.multi_reduction <add>, %73, %cst_37 [1] : vector<8x16xf32> to vector<8xf32>
    %75 = vector.shape_cast %74 : vector<8xf32> to vector<8x1xf32>
    %cst_38 = arith.constant 1.600000e+01 : f32
    %76 = vector.broadcast %cst_38 : f32 to vector<8x1xf32>
    %77 = arith.divf %75, %76 : vector<8x1xf32>
    %78 = vector.broadcast %77 : vector<8x1xf32> to vector<8x16xf32>
    %79 = arith.subf %73, %78 : vector<8x16xf32>
    %80 = arith.mulf %79, %79 : vector<8x16xf32>
    %cst_39 = arith.constant dense<0.000000e+00> : vector<8xf32>
    %81 = vector.multi_reduction <add>, %80, %cst_39 [1] : vector<8x16xf32> to vector<8xf32>
    %82 = vector.shape_cast %81 : vector<8xf32> to vector<8x1xf32>
    %cst_40 = arith.constant 1.600000e+01 : f32
    %83 = vector.broadcast %cst_40 : f32 to vector<8x1xf32>
    %84 = arith.divf %82, %83 : vector<8x1xf32>
    %cst_41 = arith.constant 9.99999974E-6 : f32
    %85 = vector.broadcast %cst_41 : f32 to vector<8x1xf32>
    %86 = arith.addf %84, %85 : vector<8x1xf32>
    %87 = math.rsqrt %86 : vector<8x1xf32>
    %88 = vector.broadcast %87 : vector<8x1xf32> to vector<8x16xf32>
    %89 = arith.mulf %79, %88 : vector<8x16xf32>
    %c0_42 = arith.constant 0 : index
    %c0_43 = arith.constant 0 : index
    %90 = vector.load %arg11[%c0_42, %c0_43] : memref<16x8xf32, #tpu.memory_space<vmem>>, vector<16x8xf32>
    %cst_44 = arith.constant dense<0.000000e+00> : vector<8x8xf32>
    %91 = tpu.matmul %89, %90, %cst_44 {dimension_numbers = #tpu.dot_dimension_numbers<[1], [0], [0], [1], [0, 0, 1, 1], [], []>} : vector<8x16xf32>, vector<16x8xf32>, vector<8x8xf32> -> vector<8x8xf32>
    %c0_45 = arith.constant 0 : index
    %c0_46 = arith.constant 0 : index
    %92 = vector.load %arg12[%c0_45, %c0_46] : memref<1x8xf32, #tpu.memory_space<vmem>>, vector<1x8xf32>
    %93 = vector.broadcast %92 : vector<1x8xf32> to vector<8x8xf32>
    %94 = arith.addf %91, %93 : vector<8x8xf32>
    %cst_47 = arith.constant 5.000000e-01 : f32
    %95 = vector.broadcast %cst_47 : f32 to vector<8x8xf32>
    %96 = arith.mulf %95, %94 : vector<8x8xf32>
    %cst_48 = arith.constant 5.000000e-01 : f32
    %97 = vector.broadcast %cst_48 : f32 to vector<8x8xf32>
    %98 = arith.mulf %97, %94 : vector<8x8xf32>
    %99 = math.tanh %98 : vector<8x8xf32>
    %cst_49 = arith.constant 1.000000e+00 : f32
    %100 = vector.broadcast %cst_49 : f32 to vector<8x8xf32>
    %101 = arith.addf %100, %99 : vector<8x8xf32>
    %102 = arith.mulf %96, %101 : vector<8x8xf32>
    %cst_50 = arith.constant dense<0.000000e+00> : vector<8xf32>
    %103 = vector.multi_reduction <add>, %102, %cst_50 [1] : vector<8x8xf32> to vector<8xf32>
    %104 = vector.shape_cast %103 : vector<8xf32> to vector<8x1xf32>
    %cst_51 = arith.constant 8.000000e+00 : f32
    %105 = vector.broadcast %cst_51 : f32 to vector<8x1xf32>
    %106 = arith.divf %104, %105 : vector<8x1xf32>
    %107 = vector.broadcast %106 : vector<8x1xf32> to vector<8x8xf32>
    %108 = arith.subf %102, %107 : vector<8x8xf32>
    %109 = arith.mulf %108, %108 : vector<8x8xf32>
    %cst_52 = arith.constant dense<0.000000e+00> : vector<8xf32>
    %110 = vector.multi_reduction <add>, %109, %cst_52 [1] : vector<8x8xf32> to vector<8xf32>
    %111 = vector.shape_cast %110 : vector<8xf32> to vector<8x1xf32>
    %cst_53 = arith.constant 8.000000e+00 : f32
    %112 = vector.broadcast %cst_53 : f32 to vector<8x1xf32>
    %113 = arith.divf %111, %112 : vector<8x1xf32>
    %cst_54 = arith.constant 9.99999974E-6 : f32
    %114 = vector.broadcast %cst_54 : f32 to vector<8x1xf32>
    %115 = arith.addf %113, %114 : vector<8x1xf32>
    %116 = math.rsqrt %115 : vector<8x1xf32>
    %117 = vector.broadcast %116 : vector<8x1xf32> to vector<8x8xf32>
    %118 = arith.mulf %108, %117 : vector<8x8xf32>
    %c0_55 = arith.constant 0 : index
    %c0_56 = arith.constant 0 : index
    %119 = vector.load %arg13[%c0_55, %c0_56] : memref<8x12xf32, #tpu.memory_space<vmem>>, vector<8x12xf32>
    %cst_57 = arith.constant dense<0.000000e+00> : vector<8x12xf32>
    %120 = tpu.matmul %118, %119, %cst_57 {dimension_numbers = #tpu.dot_dimension_numbers<[1], [0], [0], [1], [0, 0, 1, 1], [], []>} : vector<8x8xf32>, vector<8x12xf32>, vector<8x12xf32> -> vector<8x12xf32>
    %c0_58 = arith.constant 0 : index
    %c0_59 = arith.constant 0 : index
    %121 = vector.load %arg14[%c0_58, %c0_59] : memref<1x12xf32, #tpu.memory_space<vmem>>, vector<1x12xf32>
    %122 = vector.broadcast %121 : vector<1x12xf32> to vector<8x12xf32>
    %123 = arith.addf %120, %122 : vector<8x12xf32>
    %c0_60 = arith.constant 0 : index
    %c0_61 = arith.constant 0 : index
    %124 = vector.load %arg15[%c0_60, %c0_61] : memref<8x12xf32, #tpu.memory_space<vmem>>, vector<8x12xf32>
    tpu.vector_store %arg15[%c0_60, %c0_61], %123 {strides = array<i32>} : memref<8x12xf32, #tpu.memory_space<vmem>>, vector<8x12xf32>,
    return
  }
  func.func @transform_0(%arg0: i32) -> (i32, i32) {
    %c0_i32 = arith.constant 0 : i32
    %c0_i32_0 = arith.constant 0 : i32
    return %arg0, %c0_i32 : i32, i32
  }
  func.func @transform_1(%arg0: i32) -> (i32, i32) {
    %c0_i32 = arith.constant 0 : i32
    %c0_i32_0 = arith.constant 0 : i32
    return %arg0, %c0_i32 : i32, i32
  }
  func.func @transform_2(%arg0: i32) -> (i32, i32) {
    %c0_i32 = arith.constant 0 : i32
    %c0_i32_0 = arith.constant 0 : i32
    %c0_i32_1 = arith.constant 0 : i32
    return %c0_i32, %c0_i32_0 : i32, i32
  }
  func.func @transform_3(%arg0: i32) -> (i32, i32) {
    %c0_i32 = arith.constant 0 : i32
    %c0_i32_0 = arith.constant 0 : i32
    %c0_i32_1 = arith.constant 0 : i32
    return %c0_i32, %c0_i32_0 : i32, i32
  }
  func.func @transform_4(%arg0: i32) -> (i32, i32) {
    %c0_i32 = arith.constant 0 : i32
    %c0_i32_0 = arith.constant 0 : i32
    %c0_i32_1 = arith.constant 0 : i32
    return %c0_i32, %c0_i32_0 : i32, i32
  }
  func.func @transform_5(%arg0: i32) -> (i32, i32) {
    %c0_i32 = arith.constant 0 : i32
    %c0_i32_0 = arith.constant 0 : i32
    %c0_i32_1 = arith.constant 0 : i32
    return %c0_i32, %c0_i32_0 : i32, i32
  }
  func.func @transform_6(%arg0: i32) -> (i32, i32) {
    %c0_i32 = arith.constant 0 : i32
    %c0_i32_0 = arith.constant 0 : i32
    %c0_i32_1 = arith.constant 0 : i32
    return %c0_i32, %c0_i32_0 : i32, i32
  }
  func.func @transform_7(%arg0: i32) -> (i32, i32) {
    %c0_i32 = arith.constant 0 : i32
    %c0_i32_0 = arith.constant 0 : i32
    %c0_i32_1 = arith.constant 0 : i32
    return %c0_i32, %c0_i32_0 : i32, i32
  }
  func.func @transform_8(%arg0: i32) -> (i32, i32) {
    %c0_i32 = arith.constant 0 : i32
    %c0_i32_0 = arith.constant 0 : i32
    %c0_i32_1 = arith.constant 0 : i32
    return %c0_i32, %c0_i32_0 : i32, i32
  }
  func.func @transform_9(%arg0: i32) -> (i32, i32) {
    %c0_i32 = arith.constant 0 : i32
    %c0_i32_0 = arith.constant 0 : i32
    %c0_i32_1 = arith.constant 0 : i32
    return %c0_i32, %c0_i32_0 : i32, i32
  }
  func.func @transform_10(%arg0: i32) -> (i32, i32) {
    %c0_i32 = arith.constant 0 : i32
    %c0_i32_0 = arith.constant 0 : i32
    %c0_i32_1 = arith.constant 0 : i32
    return %c0_i32, %c0_i32_0 : i32, i32
  }
  func.func @transform_11(%arg0: i32) -> (i32, i32) {
    %c0_i32 = arith.constant 0 : i32
    %c0_i32_0 = arith.constant 0 : i32
    %c0_i32_1 = arith.constant 0 : i32
    return %c0_i32, %c0_i32_0 : i32, i32
  }
  func.func @transform_12(%arg0: i32) -> (i32, i32) {
    %c0_i32 = arith.constant 0 : i32
    %c0_i32_0 = arith.constant 0 : i32
    %c0_i32_1 = arith.constant 0 : i32
    return %c0_i32, %c0_i32_0 : i32, i32
  }
  func.func @transform_13(%arg0: i32) -> (i32, i32) {
    %c0_i32 = arith.constant 0 : i32
    %c0_i32_0 = arith.constant 0 : i32
    %c0_i32_1 = arith.constant 0 : i32
    return %c0_i32, %c0_i32_0 : i32, i32
  }
  func.func @transform_14(%arg0: i32) -> (i32, i32) {
    %c0_i32 = arith.constant 0 : i32
    %c0_i32_0 = arith.constant 0 : i32
    return %arg0, %c0_i32 : i32, i32
  }
}

</mosaic_0001>

<bundles_post_ra>
// kernel: tpu_custom_call.1
= control target key start
LH: loop header
LB: loop body
LE: loop exit
PB: predicated region body
PF: predicated region fallthrough
CT: control target
= control target key end

     0   :  { %s1756_s0 = inlined_call_operand.vmem [shape: f32[16,16], index: 0, kind: input, shape index: {}]   ;;  %s1757_s1 = inlined_call_operand.vmem [shape: f32[16,1], index: 1, kind: input, shape index: {}]   ;;  %s1758_s2 = inlined_call_operand.vmem [shape: f32[1,64], index: 2, kind: input, shape index: {}]   ;;  %s1759_s3 = inlined_call_operand.vmem [shape: f32[1,64], index: 3, kind: input, shape index: {}]   ;;  %s1760_s4 = inlined_call_operand.vmem [shape: f32[16,64], index: 4, kind: input, shape index: {}]   ;;  %s1761_s5 = inlined_call_operand.vmem [shape: f32[1,64], index: 5, kind: input, shape index: {}]   ;;  %s1762_s6 = inlined_call_operand.vmem [shape: f32[64,32], index: 6, kind: input, shape index: {}]   ;;  %s1763_s7 = inlined_call_operand.vmem [shape: f32[1,32], index: 7, kind: input, shape index: {}]   ;;  %s1764_s8 = inlined_call_operand.vmem [shape: f32[32,16], index: 8, kind: input, shape index: {}]   ;;  %s1765_s9 = inlined_call_operand.vmem [shape: f32[1,16], index: 9, kind: input, shape index: {}]   ;;  %s1766_s10 = inlined_call_operand.vmem [shape: f32[16,8], index: 10, kind: input, shape index: {}]   ;;  %s1767_s11 = inlined_call_operand.vmem [shape: f32[1,8], index: 11, kind: input, shape index: {}]   ;;  %s1768_s12 = inlined_call_operand.vmem [shape: f32[8,12], index: 12, kind: input, shape index: {}]   ;;  %s1769_s13 = inlined_call_operand.vmem [shape: f32[1,12], index: 13, kind: input, shape index: {}]   ;;  %s1770_s14 = inlined_call_operand.hbm [shape: f32[16,12], index: 14, kind: output, shape index: {}]  }
   0x1   :  { %1774 = sst [smem:[#allocation8_spill]] %s1760_s4 }
   0x2   :  { %19 = vsyncpa [#allocation3], 0 }
   0x3   :  { %21 = vsyncpa [#allocation3 + $0x1], 0  ;;  %s1528_s29 = smov 0   ;;  %s1530_s30 = smov 0  }
   0x4   :  { %s1532_s15 = smov 0   ;;  %s1534_s16 = smov 0  }
   0x5 LB: > { %1775 = sst [smem:[#allocation5_spill]] %s1436_s15  ;;  %s1549_s17 = sadd.s32 4294967295, %s1440_s16   ;;  %s1440_s16 = sphi %s1534_s16, %s1781_s16   ;;  %s1436_s15 = sphi %s1532_s15, %s1783_s15   ;;  %s1432_s30 = sphi %s1530_s30, %s1785_s30   ;;  %s1428_s29 = sphi %s1528_s29, %s1784_s29  }
   0x6   : > { %s1184_s18 = sadd.s32 4294967294, %s1440_s16   ;;  %s1553_s19 = sadd.s32 1, %s1440_s16  }
   0x7   : > { %1776 = sst [smem:[#allocation6_spill]] %s1553_s19  ;;  %s338_s20 = sadd.s32 1, %s1436_s15 }
   0x8   : > { %s335_s21 = ssub.s32 %s1440_s16, %s1553_s19  ;;  %p348_p0 = scmp.ne.s32.totalorder %s1436_s15, %s1432_s30 }
   0x9   : > { %p336_p1 = scmp.eq.s32.totalorder %s335_s21, 0  ;;  %p349_p2 = scmp.eq.s32.totalorder %s1549_s17, 1 }
   0xa   : > { %p354_p3 = scmp.ne.s32.totalorder %s1432_s30, %s1428_s29  ;;  %p355_p4 = scmp.eq.s32.totalorder %s1184_s18, 1 }
   0xb   : > { %s1564_s22 = scalar_select %p336_p1, %s1436_s15, %s338_s20  }
   0xc   : > { %p1566_p5 = por %p349_p2, %p348_p0  ;;  %p1570_p6 = por %p355_p4, %p354_p3 }
   0xd   : > { %1777 = sst [smem:[#allocation7_spill]] %s1564_s22  ;;  %p1187_p7 = scmp.ge.s32.totalorder %s1440_s16, 1 }
   0xe   : > { %p423_p8 = scmp.lt.s32.totalorder %s1440_s16, 3 }
  0x10   : > { %p424_p9 = pnand %p1187_p7, %p423_p8 }
  0x11   : > { %s1780_s4 = sld [smem:[#allocation8_spill]] (!%p424_p9)  ;;  %v1442_v2 = vmov (!%p424_p9), 0.0|0.0   ;;  %v1443_v4 = vmov (!%p424_p9), 0   ;;  %p472_p10 = scmp.lt.s32.totalorder (!%p424_p9), %s1549_s17, 1  ;;  %vm1444_vm0 = vmmov (!%p424_p9), 0   ;;  %v1445_v5 = vmov (!%p424_p9), 0.0  }
  0x12   : > { %427 = sbr.rel (%p424_p9) target bundleno = 2404 (0x964), region = 76  ;;  %1282 = vmatprep.subr.bf16.mxu0 (!%p424_p9), %v1442_v2  ;;  %1359 = vset.pattern.permute.xlu0 (!%p424_p9), %v1443_v4  ;;  %vm490_vm1 = vcmask (!%p424_p9), 130048   ;;  %v1193_v8 = vld [vmem:[%s1758_s2] ss:$0 sm:$0xff] (!%p424_p9)  ;;  %v1446_v23 = vmov (!%p424_p9), 2102212464  }
  0x13   : > { %1237 = vmatprep.mubr.msk.f32.mxu0 (!%p424_p9), %vm1444_vm0, %v1445_v5  ;;  %1285 = vmatprep.subr.bf16.mxu1 (!%p424_p9), %v1442_v2  ;;  %v1194_v9 = vld [vmem:[%s1759_s3] ss:$0 sm:$0xff] (!%p424_p9)  ;;  %v1447_v25 = vmov (!%p424_p9), 920167782   ;;  %v1448_v28 = vmov (!%p424_p9), 683565275  }
  0x14   : > { %1256 = vmatprep.mubr.msk.f32.mxu1 (!%p424_p9), %vm1444_vm0, %v1445_v5  ;;  %v1449_v30 = vmov (!%p424_p9), 2475754826   ;;  %v1450_v32 = vmov (!%p424_p9), 2131351028   ;;  %v1451_v35 = vmov (!%p424_p9), 1326507024  }
  0x15   : > { %vm691_vm15 = vcmask (!%p424_p9), 523264   ;;  %s469_s21 = sand.u32 (!%p424_p9), 1, %s1432_s30   ;;  %s1208_s28 = sshll.u32 (!%p424_p9), %s1549_s17, 7 }
  0x16   : > { %s1188_s25 = sshll.u32 (!%p424_p9), %s469_s21, 3  ;;  %s1714_s22 = scalar_lea.hbm (!%p424_p9), %s1770_s14, %s1208_s28 }
  0x17   : > { %v481_v0 = vld [vmem:[%s1780_s4] sm:$0xff] (!%p424_p9)  ;;  %v482_v1 = vld [vmem:[%s1780_s4 + $0x8] sm:$0xff] (!%p424_p9) }
  0x18   : > { %v1283_v3 = vpack.c.bf16 (!%p424_p9), %v482_v1, %v481_v0 }
  0x19   : > { %s473_s18 = scalar_select %p472_p10, %s1549_s17, 1 }
  0x1a   : > { %1284 = vmatpush3.bf16.msra.mxu0 %v1283_v3  ;;  %s1452_s17 = smov [#allocation2]  }
  0x1b   : > { %1297 = vmatprep.subr.bf16.mxu0 %v1442_v2  ;;  %s1189_s20 = sshll.u32 %s473_s18, 3  ;;  %s471_s18 = scalar_lea.vmem [#allocation2], %s1188_s25 }
  0x1c   : > { %s479_s26 = scalar_lea.vmem %s1757_s1, %s1189_s20  ;;  %s475_s4 = scalar_lea.vmem %s1756_s0, %s1189_s20 }
  0x1d   : > { %v564_v6 = vld [vmem:[%s479_s26] sm:$0xff]  ;;  %s1100_s20 = scalar_lea.sflag [#allocation3], %s469_s21  ;;  %s1382_s25 = sshll.u32 %s1452_s17, 4  ;;  %s1383_s25 = int_to_ptr.vmem [resolvable:$false] %s1382_s25 }
  0x1e   : > { %v480_v7 = vld [vmem:[%s475_s4] sm:$0xff]  ;;  %568 = vperm.xlu0 %1359, %v564_v6   ;;  %s1113_s4 = sshll.u32 %s471_s18, 4  ;;  %s1384_s27 = scalar_lea.vmem %s1383_s25, 256  ;;  %s1716_s4 = int_to_ptr.vmem [resolvable:$true] %s1113_s4 }
  0x1f   : > { %1238 = vmatmul.mubr.msk.f32.vlgmr.msra.gmra.mrb[0].mxu0 %vm490_vm1, %v480_v7  ;;  %s1378_s26 = scalar_lea.vmem %s1716_s4, 128  ;;  %p1385_p0 = scmp.lt.s32.totalorder %s1716_s4, %s1383_s25 }
  0x20   : > { %1267 = vmatprep.mubr.msk.f32.mxu0 %vm1444_vm0, %v1445_v5  ;;  %p1379_p11 = scmp.ne.s32.totalorder %s1716_s4, %s1378_s26  ;;  %p1386_p1 = scmp.lt.s32.totalorder %s1384_s27, %s1378_s26 }
  0x22   : > { %p1380_p12 = pnand %p1379_p11, %p1566_p5  ;;  %p1387_p2 = por %p1386_p1, %p1385_p0 }
  0x24   : > { %p1381_p13 = pneg %p1380_p12 }
  0x26   : > { %p1388_p3 = pnand %p1387_p2, %p1381_p13 }
  0x9d   : > { %v569_v10 = vpop.permute.xlu0 %568 }
  0x9e   : > { %v577_v11 = vmul.f32 %v1193_v8, %v569_v10 }
  0xa0   : > { %v1606_v12 = vadd.f32 %v1194_v9, %v577_v11 }
  0xa2   : > { %v589_v13 = vand.u32 2139095040, %v1606_v12  ;;  %v586_v15 = vand.u32 2147483647, %v1606_v12  ;;  %vm588_vm9 = vcmp.lt.s32.totalorder %v1606_v12, 0  ;;  %vm678_vm14 = vweird.f32 %v1606_v12 }
  0xa4   : > { %v590_v14 = vshrl.u32 %v589_v13, 23  ;;  %v593_v18 = vand.u32 8388607, %v586_v15  ;;  %vm587_vm10 = vcmp.le.f32.partialorder %v586_v15, 0.7853982 }
  0xa6   : > { %v1195_v16 = vadd.s32 4294967169, %v590_v14  ;;  %v594_v21 = vor.u32 8388608, %v593_v18 }
  0xa8   : > { %v596_v17 = vadd.s32 1, %v1195_v16  ;;  %v634_v40 = vshll.u32 %v594_v21, 8 }
  0xaa   : > { %vm597_vm2 = vcmp.gt.s32.totalorder %v596_v17, 0 }
  0xab   : > { %v598_v19 = vsel %vm597_vm2, %v596_v17, 0  ;;  %vm798_vm2 = vcmask 261120  }
  0xac   : > { %v600_v20 = vand.u32 31, %v598_v19  ;;  %v599_v27 = vshrl.u32 %v598_v19, 5 }
  0xae   : > { %v601_v22 = vsub.s32 32, %v600_v20  ;;  %v612_v24 = vshll.u32 %v1446_v23, %v600_v20  ;;  %v615_v26 = vshll.u32 %v1447_v25, %v600_v20  ;;  %v603_v29 = vshll.u32 %v1448_v28, %v600_v20 }
  0xaf   : > { %v606_v31 = vshll.u32 %v1449_v30, %v600_v20  ;;  %v609_v33 = vshll.u32 %v1450_v32, %v600_v20  ;;  %vm621_vm3 = vcmp.lt.s32.totalorder %v599_v27, 4  ;;  %vm618_vm4 = vcmp.lt.s32.totalorder %v599_v27, 1 }
  0xb0   : > { %v613_v34 = vshrl.u32 %v1447_v25, %v601_v22  ;;  %v616_v36 = vshrl.u32 %v1451_v35, %v601_v22  ;;  %v604_v37 = vshrl.u32 %v1449_v30, %v601_v22  ;;  %v607_v38 = vshrl.u32 %v1450_v32, %v601_v22 }
  0xb1   : > { %v610_v39 = vshrl.u32 %v1446_v23, %v601_v22  ;;  %v602_v43 = vshrl.u32 %v1448_v28, %v601_v22  ;;  %vm619_vm5 = vcmp.lt.s32.totalorder %v599_v27, 2  ;;  %vm620_vm6 = vcmp.lt.s32.totalorder %v599_v27, 3 }
  0xb2   : > { %v614_v41 = vor.u32 %v613_v34, %v612_v24  ;;  %v617_v42 = vor.u32 %v616_v36, %v615_v26  ;;  %v605_v44 = vor.u32 %v604_v37, %v603_v29  ;;  %v608_v45 = vor.u32 %v607_v38, %v606_v31 }
  0xb3   : > { %v611_v46 = vor.u32 %v610_v39, %v609_v33 }
  0xb4   : > { %v627_v47 = vsel %vm621_vm3, %v614_v41, 920167782  ;;  %v631_v48 = vsel %vm621_vm3, %v617_v42, 1326507024  ;;  %v626_v50 = vsel %vm618_vm4, %v605_v44, %v608_v45  ;;  %v622_v53 = vsel %vm618_vm4, %v602_v43, %v605_v44 }
  0xb5   : > { %v623_v49 = vsel %vm621_vm3, %v611_v46, 2102212464  ;;  %v628_v51 = vsel %vm620_vm6, %v611_v46, %v627_v47  ;;  %v630_v52 = vsel %vm618_vm4, %v608_v45, %v611_v46  ;;  %v632_v56 = vsel %vm620_vm6, %v614_v41, %v631_v48 }
  0xb6   : > { %v624_v54 = vsel %vm620_vm6, %v608_v45, %v623_v49  ;;  %v629_v55 = vsel %vm619_vm5, %v626_v50, %v628_v51  ;;  %v633_v57 = vsel %vm619_vm5, %v630_v52, %v632_v56  ;;  %v708_v56 = vld [vmem:[%s1762_s6 + $0x10] sm:$0xff]  ;;  %vm1001_vm3 = vcmask 64512  }
  0xb7   : > { %v1612_v58 = vmul.u32.u64.low %v634_v40, %v629_v55  ;;  %v1613_v59 = vmul.u32.u64.high %v634_v40, %v629_v55, %v1612_v58  ;;  %v1615_v60 = vmul.u32.u64.low %v634_v40, %v633_v57  ;;  %v1616_v61 = vmul.u32.u64.high %v634_v40, %v633_v57, %v1615_v60  ;;  %v709_v57 = vld [vmem:[%s1762_s6 + $0x18] sm:$0xff] }
  0xb8   : > { %v625_v62 = vsel %vm619_vm5, %v622_v53, %v624_v54  ;;  %v706_v54 = vld [vmem:[%s1762_s6] sm:$0xff]  ;;  %v711_v60 = vld [vmem:[%s1762_s6 + $0x28] sm:$0xff] }
  0xb9   : > { %v644_v63 = vadd.s32 1, %v1613_v59  ;;  %v641_v0 = vmul.u32 %v634_v40, %v625_v62  ;;  %vm643_vm7 = vc.u32 %v1616_v61, %v1612_v58  ;;  %v642_v16 = vadd.s32 %v1612_v58, %v1616_v61  ;;  %v1191_v40 = vld [vmem:[%s1761_s5] ss:$0 sm:$0xff]  ;;  %v712_v62 = vld [vmem:[%s1762_s6 + $0x30] sm:$0xff] }
  0xba   : > { %v1289_v58 = vpack.c.bf16 %v709_v57, %v708_v56 }
  0xbb   : > { %v645_v1 = vsel %vm643_vm7, %v644_v63, %v1613_v59  ;;  %v710_v59 = vld [vmem:[%s1762_s6 + $0x20] sm:$0xff]  ;;  %v713_v63 = vld [vmem:[%s1762_s6 + $0x38] sm:$0xff] }
  0xbc   : > { %v646_v3 = vadd.s32 %v645_v1, %v641_v0  ;;  %v1292_v61 = vpack.c.bf16 %v711_v60, %v710_v59  ;;  %v1295_v0 = vpack.c.bf16 %v713_v63, %v712_v62 }
  0xbe   : > { %v647_v4 = vadd.s32 536870912, %v646_v3 }
  0xc0   : > { %v648_v6 = vshrl.u32 %v647_v4, 30 }
  0xc2   : > { %v649_v7 = vshll.u32 %v648_v6, 30  ;;  %v672_v28 = vsub.s32 4, %v648_v6 }
  0xc4   : > { %v650_v8 = vsub.s32 %v646_v3, %v649_v7  ;;  %v673_v31 = vsel %vm588_vm9, %v672_v28, %v648_v6  ;;  %v816_v28 = vld [vmem:[%s1764_s8 + $0x18] sm:$0xff] }
  0xc5   : > { %v675_v33 = vsel %vm587_vm10, 0, %v673_v31 }
  0xc6   : > { %v652_v9 = vsub.s32 0, %v650_v8  ;;  %v679_v34 = vadd.s32 3, %v675_v33 }
  0xc8   : > { %v1196_v10 = vmin.u32 %v652_v9, %v650_v8  ;;  %v680_v35 = vand.u32 3, %v679_v34 }
  0xca   : > { %v654_v11 = vclz %v1196_v10  ;;  %vm685_vm11 = vcmp.eq.s32.totalorder %v680_v35, 2  ;;  %vm682_vm12 = vcmp.eq.s32.totalorder %v680_v35, 0  ;;  %vm681_vm13 = vcmp.lt.s32.totalorder %v680_v35, 2  ;;  %v1201_v35 = vld [vmem:[%s1765_s9] ss:$0 sm:$0xff] }
  0xcc   : > { %v1197_v13 = vadd.s32 4294967294, %v654_v11 }
  0xce   : > { %vm1198_vm8 = vcmp.lt.s32.totalorder %v1197_v13, 0 }
  0xcf   : > { %v657_v14 = vsel %vm1198_vm8, 0, %v1197_v13 }
  0xd0   : > { %v658_v17 = vsub.s32 32, %v657_v14  ;;  %v662_v18 = vsub.s32 4294967266, %v657_v14  ;;  %v659_v19 = vshll.u32 %v650_v8, %v657_v14  ;;  %v1199_v8 = vld [vmem:[%s1763_s7] ss:$0 sm:$0xff] }
  0xd2   : > { %v660_v20 = vshrl.u32 %v642_v16, %v658_v17  ;;  %v663_v21 = vadd.s32 127, %v662_v18 }
  0xd4   : > { %v661_v22 = vor.u32 %v660_v20, %v659_v19  ;;  %v664_v23 = vshll.u32 %v663_v21, 23 }
  0xd6   : > { %v665_v24 = vor.u32 4788187, %v664_v23  ;;  %v668_v26 = vcvt.s32.f32 %v661_v22 }
  0xd8   : > { %v666_v25 = vand.u32 2147483647, %v665_v24  ;;  %v813_v24 = vld [vmem:[%s1764_s8] sm:$0xff] }
  0xda   : > { %v669_v27 = vmul.f32 %v668_v26, %v666_v25  ;;  %v814_v25 = vld [vmem:[%s1764_s8 + $0x8] sm:$0xff]  ;;  %v815_v26 = vld [vmem:[%s1764_s8 + $0x10] sm:$0xff] }
  0xdc   : > { %v670_v29 = vxor.u32 2147483648, %v669_v27 }
  0xde   : > { %v671_v30 = vsel %vm588_vm9, %v670_v29, %v669_v27  ;;  %v1298_v27 = vpack.c.bf16 %v814_v25, %v813_v24  ;;  %v1301_v29 = vpack.c.bf16 %v816_v28, %v815_v26 }
  0xdf   : > { %v674_v32 = vsel %vm587_vm10, %v1606_v12, %v671_v30  ;;  %v707_v12 = vld [vmem:[%s1762_s6 + $0x8] sm:$0xff] }
  0xe0   : > { %1360 = vcosq.f32 %v674_v32  ;;  %v1286_v55 = vpack.c.bf16 %v707_v12, %v706_v54  ;;  %1299 = vmatpush3.bf16.msra.mxu0 %v1298_v27  ;;  %v1203_v12 = vld [vmem:[%s1767_s11] ss:$0 sm:$0xff] }
  0xe1   : > { %1362 = vsinq.f32 %v674_v32  ;;  %1300 = vmatprep.subr.bf16.mxu0 %v1442_v2 }
  0xe2   : > { %1287 = vmatpush3.bf16.msra.mxu1 %v1286_v55 }
  0xe3   : > { %1288 = vmatprep.subr.bf16.mxu1 %v1442_v2 }
  0xe4   : > { %1302 = vmatpush3.bf16.msra.mxu0 %v1301_v29 }
  0xe5   : > { %1303 = vmatprep.subr.bf16.mxu0 %v1442_v2 }
  0xe6   : > { %1290 = vmatpush3.bf16.msra.mxu1 %v1289_v58 }
  0xe7   : > { %1291 = vmatprep.subr.bf16.mxu1 %v1442_v2 }
  0xea   : > { %v1361_v36 = vpop.eup %1360  ;;  %1293 = vmatpush3.bf16.msra.mxu1 %v1292_v61 }
  0xeb   : > { %v1363_v37 = vpop.eup %1362  ;;  %v686_v38 = vxor.u32 2147483648, %v1361_v36  ;;  %1294 = vmatprep.subr.bf16.mxu1 %v1442_v2 }
  0xec   : > { %v683_v39 = vxor.u32 2147483648, %v1363_v37 }
  0xed   : > { %v687_v15 = vsel %vm685_vm11, %v686_v38, %v1363_v37 }
  0xee   : > { %v684_v41 = vsel %vm682_vm12, %v1361_v36, %v683_v39  ;;  %1296 = vmatpush3.bf16.msra.mxu1 %v1295_v0 }
  0xef   : > { %v688_v43 = vsel %vm681_vm13, %v684_v41, %v687_v15 }
  0xf0   : > { %v689_v46 = vsel %vm678_vm14, nan, %v688_v43 }
  0xf2   : > { %v560_v42 = vpop.f32.mrb[0].mxu0 }
  0xf3   : > { %v561_v44 = vadd.f32 %v1191_v40, %v560_v42  ;;  %v1239_v45 = vpop.f32.mrb[1].mxu0 }
  0xf5   : > { %v690_v47 = vadd.f32 %v689_v46, %v561_v44 }
  0xf7   : > { %v692_v48 = vsel %vm691_vm15, %v690_v47, 0.0 }
  0xf8   : > { %693 = vadd.xlane.f32.xlu0 %v692_v48  ;;  %v916_v48 = vld [vmem:[%s1766_s10 + $0x8] sm:$0xff] }
 0x185   : > { %v694_v49 = vpop.xlane.xlu0 %693 }
 0x186   : > { %v696_v50 = vmul.f32 0.015625, %v694_v49 }
 0x188   : > { %v697_v51 = vsub.f32 %v690_v47, %v696_v50  ;;  %v915_v47 = vld [vmem:[%s1766_s10] sm:$0xff] }
 0x189   : > { %v1304_v49 = vpack.c.bf16 %v916_v48, %v915_v47 }
 0x18a   : > { %v698_v52 = vmul.f32 %v697_v51, %v697_v51 }
 0x18c   : > { %v699_v53 = vsel %vm691_vm15, %v698_v52, 0.0 }
 0x18d   : > { %700 = vadd.xlane.f32.xlu1 %v699_v53 }
 0x21a   : > { %v701_v1 = vpop.xlane.xlu1 %700 }
 0x21b   : > { %v702_v3 = vmul.f32 0.015625, %v701_v1 }
 0x21d   : > { %v703_v4 = vadd.f32 1e-05, %v702_v3 }
 0x21f   : > { %1364 = vrsqrt.f32 %v703_v4  ;;  %v1016_v4 = vld [vmem:[%s1768_s12] sm:$0xff] }
 0x229   : > { %v1365_v6 = vpop.eup %1364 }
 0x22a   : > { %v705_v7 = vmul.f32 %v1365_v6, %v697_v51 }
 0x22c   : > { %1257 = vmatmul.mubr.msk.f32.vlgmr.msra.gmra.mrb[0].mxu1 %vm691_vm15, %v705_v7 }
 0x2ff   : > { %v790_v9 = vpop.f32.mrb[0].mxu1 }
 0x300   : > { %v791_v10 = vadd.f32 %v1199_v8, %v790_v9  ;;  %v1258_v11 = vpop.f32.mrb[1].mxu1 }
 0x301   : > { %v1205_v11 = vld [vmem:[%s1769_s13] ss:$0 sm:$0xff] }
 0x302   : > { %v794_v13 = vmul.f32 0.5, %v791_v10 }
 0x304   : > { %1366 = vtanh.f32 %v794_v13 }
 0x30e   : > { %v1367_v14 = vpop.eup %1366 }
 0x30f   : > { %v796_v16 = vadd.f32 1.0, %v1367_v14 }
 0x311   : > { %v797_v17 = vmul.f32 %v796_v16, %v794_v13 }
 0x313   : > { %v799_v18 = vsel %vm798_vm2, %v797_v17, 0.0 }
 0x314   : > { %800 = vadd.xlane.f32.xlu1 %v799_v18 }
 0x3a1   : > { %v801_v19 = vpop.xlane.xlu1 %800 }
 0x3a2   : > { %v803_v20 = vmul.f32 0.03125, %v801_v19 }
 0x3a4   : > { %v804_v21 = vsub.f32 %v797_v17, %v803_v20 }
 0x3a6   : > { %v805_v22 = vmul.f32 %v804_v21, %v804_v21 }
 0x3a8   : > { %v806_v23 = vsel %vm798_vm2, %v805_v22, 0.0 }
 0x3a9   : > { %807 = vadd.xlane.f32.xlu1 %v806_v23 }
 0x436   : > { %v808_v30 = vpop.xlane.xlu1 %807 }
 0x437   : > { %v809_v31 = vmul.f32 0.03125, %v808_v30 }
 0x439   : > { %v810_v32 = vadd.f32 1e-05, %v809_v31 }
 0x43b   : > { %1368 = vrsqrt.f32 %v810_v32 }
 0x445   : > { %v1369_v33 = vpop.eup %1368 }
 0x446   : > { %v812_v34 = vmul.f32 %v1369_v33, %v804_v21 }
 0x448   : > { %1268 = vmatmul.mubr.msk.f32.vlgmr.msra.gmra.mrb[2].mxu0 %vm798_vm2, %v812_v34 }
 0x449   : > { %1274 = vmatprep.mubr.msk.f32.mxu0 %vm1444_vm0, %v1445_v5  ;;  %1305 = vmatpush3.bf16.msra.mxu0 %v1304_v49 }
 0x44a   : > { %1277 = vmatprep.subr.mxu0 %v1445_v5 }
 0x51b   : > { %v893_v36 = vpop.f32.mrb[2].mxu0 }
 0x51c   : > { %v894_v37 = vadd.f32 %v1201_v35, %v893_v36  ;;  %v1269_v38 = vpop.f32.mrb[3].mxu0 }
 0x51e   : > { %v897_v39 = vmul.f32 0.5, %v894_v37 }
 0x520   : > { %1370 = vtanh.f32 %v897_v39 }
 0x52a   : > { %v1371_v2 = vpop.eup %1370 }
 0x52b   : > { %v899_v40 = vadd.f32 1.0, %v1371_v2 }
 0x52d   : > { %v900_v15 = vmul.f32 %v899_v40, %v897_v39 }
 0x52f   : > { %v901_v41 = vsel %vm490_vm1, %v900_v15, 0.0 }
 0x530   : > { %902 = vadd.xlane.f32.xlu1 %v901_v41 }
 0x5bd   : > { %v903_v42 = vpop.xlane.xlu1 %902 }
 0x5be   : > { %v905_v43 = vmul.f32 0.0625, %v903_v42 }
 0x5c0   : > { %v906_v44 = vsub.f32 %v900_v15, %v905_v43 }
 0x5c2   : > { %v907_v45 = vmul.f32 %v906_v44, %v906_v44 }
 0x5c4   : > { %v908_v46 = vsel %vm490_vm1, %v907_v45, 0.0 }
 0x5c5   : > { %909 = vadd.xlane.f32.xlu1 %v908_v46 }
 0x652   : > { %v910_v50 = vpop.xlane.xlu1 %909 }
 0x653   : > { %v911_v51 = vmul.f32 0.0625, %v910_v50 }
 0x655   : > { %v912_v52 = vadd.f32 1e-05, %v911_v51 }
 0x657   : > { %1372 = vrsqrt.f32 %v912_v52 }
 0x661   : > { %v1373_v53 = vpop.eup %1372 }
 0x662   : > { %v914_v54 = vmul.f32 %v1373_v53, %v906_v44 }
 0x664   : > { %1275 = vmatmul.mubr.msk.f32.vlgmr.msra.gmra.mrb[4].mxu0 %vm490_vm1, %v914_v54 }
 0x665   : > { %1279 = vmatprep.mubr.msk.f32.mxu0 %vm1444_vm0, %v1445_v5  ;;  %1278 = vmatpush3.msra.mxu0 %v1016_v4  ;;  %vm1097_vm0 = vcmask 97280  }
 0x737   : > { %v993_v55 = vpop.f32.mrb[4].mxu0 }
 0x738   : > { %v994_v56 = vadd.f32 %v1203_v12, %v993_v55  ;;  %v1276_v57 = vpop.f32.mrb[5].mxu0 }
 0x73a   : > { %v997_v58 = vmul.f32 0.5, %v994_v56 }
 0x73c   : > { %1374 = vtanh.f32 %v997_v58 }
 0x746   : > { %v1375_v59 = vpop.eup %1374 }
 0x747   : > { %v999_v60 = vadd.f32 1.0, %v1375_v59 }
 0x749   : > { %v1000_v61 = vmul.f32 %v999_v60, %v997_v58 }
 0x74b   : > { %v1002_v62 = vsel %vm1001_vm3, %v1000_v61, 0.0 }
 0x74c   : > { %1003 = vadd.xlane.f32.xlu1 %v1002_v62 }
 0x7d9   : > { %v1004_v63 = vpop.xlane.xlu1 %1003 }
 0x7da   : > { %v1006_v0 = vmul.f32 0.125, %v1004_v63 }
 0x7dc   : > { %v1007_v5 = vsub.f32 %v1000_v61, %v1006_v0 }
 0x7de   : > { %v1008_v1 = vmul.f32 %v1007_v5, %v1007_v5 }
 0x7e0   : > { %v1009_v3 = vsel %vm1001_vm3, %v1008_v1, 0.0 }
 0x7e1   : > { %1010 = vadd.xlane.f32.xlu1 %v1009_v3 }
 0x86e   : > { %v1011_v6 = vpop.xlane.xlu1 %1010 }
 0x86f   : > { %v1012_v7 = vmul.f32 0.125, %v1011_v6 }
 0x871   : > { %v1013_v8 = vadd.f32 1e-05, %v1012_v7 }
 0x873   : > { %1376 = vrsqrt.f32 %v1013_v8 }
 0x87d   : > { %v1377_v9 = vpop.eup %1376 }
 0x87e   : > { %v1015_v10 = vmul.f32 %v1377_v9, %v1007_v5 }
 0x880   : > { %1280 = vmatmul.mubr.msk.f32.vlgmr.msra.gmra.mrb[6].mxu0 %vm1001_vm3, %v1015_v10 }
 0x953   : > { %v1093_v13 = vpop.f32.mrb[6].mxu0 }
 0x954   : > { %v1094_v14 = vadd.f32 %v1205_v11, %v1093_v13  ;;  %v1281_v16 = vpop.f32.mrb[7].mxu0 }
 0x956   : > { %1098 = vst.msk [vmem:[%s471_s18] sm:$0xff] %vm1097_vm0, %v1094_v14 }
 0x957   : > { %1391 = shalt.err (!%p1388_p3)
}
 0x958   : > { %s1392_s21 = scalar_lea.hbm %s1714_s22, 128  ;;  %s1396_s15 = scalar_lea.hbm %s1770_s14, 256 }
 0x959   : > { %p1393_p4 = scmp.ne.s32.totalorder %s1714_s22, %s1392_s21  ;;  %p1397_p9 = scmp.lt.u32.totalorder %s1714_s22, %s1770_s14 }
 0x95a   : > { %p1398_p10 = scmp.lt.u32.totalorder %s1396_s15, %s1392_s21  ;;  %p1400_p12 = scmp.lt.u32.totalorder %s1392_s21, %s1714_s22 }
 0x95b   : > { %p1394_p7 = pnand %p1393_p4, %p1566_p5 }
 0x95c   : > { %p1399_p11 = por %p1398_p10, %p1397_p9 }
 0x95d   : > { %p1395_p8 = pneg %p1394_p7 }
 0x95e   : > { %p1401_p13 = por %p1400_p12, %p1399_p11 }
 0x960   : > { %p1402_p0 = pnand %p1401_p13, %p1395_p8 }
 0x962   : > { %1405 = shalt.err (!%p1402_p0)
}
 0x963   : > { %1310 = dma.vmem_to_hbm [thread:$0]  (%p1566_p5), %s1716_s4, 128, %s1714_s22, %s1100_s20  }
 0x964 PF: > { %p1316_p1 = scmp.ge.s32.totalorder %s1440_s16, 2  ;;  %s1125_s26 = sand.u32 1, %s1428_s29  }
 0x965   : > { %s1126_s25 = scalar_lea.sflag [#allocation3], %s1125_s26 }
 0x966   : > { %p1313_p2 = pnand %p1316_p1, %p1570_p6 }
 0x968   : > { %1423 = dma.done.wait (!%p1313_p2), %s1126_s25, 128  }
 0x969   : > { %1425 = vsyncadd (!%p1313_p2), %s1126_s25, 4294967168  ;;  %s1781_s16 = sld [smem:[#allocation6_spill]]  ;;  %s1782_s27 = sld [smem:[#allocation5_spill]] }
 0x96a   : > { %s1783_s15 = sld [smem:[#allocation7_spill]]  ;;  %s1784_s29 = smov %s1432_s30 }
 0x96f   : > { %p24_p3 = scmp.ge.s32.totalorder %s1781_s16, 4   ;;  %s1785_s30 = smov %s1782_s27 }
 0x971   :  { %26 = sbr.rel (!%p24_p3) target bundleno = 5 (0x5), region = 114 }
 0x978   :  { %1131 = vsyncpa [#allocation3], 1 }
 0x979   :  { %1133 = vsyncpa [#allocation3 + $0x1], 1 }

</bundles_post_ra>
